<compile_context>
chip_gen: v6e
topology: v6e:2x2x1
jax: 0.10.0
libtpu: 0.0.40
codegen_flags: <defaults>
</compile_context>

<pallas_src>
import math
import jax
import jax.numpy as jnp
from jax.experimental import pallas as pl
from jax.experimental.pallas import tpu as pltpu


def _pick_tile(dim, preferred):
    """Largest candidate that evenly divides `dim`, else the full dim."""
    for t in preferred:
        if t <= dim and dim % t == 0:
            return t
    return dim


# ---------------------------------------------------------------------------
# Tiled linear (x @ w + b) kernel — bf16 operands, f32 accumulation
# ---------------------------------------------------------------------------

def _matmul_bias_kernel(x_ref, w_ref, b_ref, o_ref, acc_ref):
    @pl.when(pl.program_id(2) == 0)
    def _():
        acc_ref[...] = jnp.zeros_like(acc_ref)

    acc_ref[...] += jnp.dot(x_ref[...], w_ref[...],
                            preferred_element_type=jnp.float32)

    @pl.when(pl.program_id(2) == pl.num_programs(2) - 1)
    def _():
        o_ref[...] = (acc_ref[...] + b_ref[...].astype(jnp.float32)).astype(o_ref.dtype)


def linear(x, w, b, *, out_dtype=None, tile_m=512, tile_n=512, tile_k=1024):
    """y = x @ w + b.  x: [M, K] (bf16), w: [K, N] (bf16), b: [N] (f32) -> [M, N]."""
    M, K = x.shape
    N = w.shape[1]
    out_dtype = out_dtype if out_dtype is not None else x.dtype

    # N / K tiles must divide exactly (K is the contraction, no masked tail allowed);
    # M uses a cdiv grid: out-of-bounds tail rows read garbage and their writes are
    # dropped, so there is no 8-row-tile cliff and no explicit padding copy.
    tm = tile_m if M >= tile_m else M
    tn = _pick_tile(N, (tile_n, 256, 128))
    tk = _pick_tile(K, (tile_k, 512, 256, 128))
    grid = (pl.cdiv(M, tm), N // tn, K // tk)

    b2 = b.reshape(1, N).astype(jnp.float32)

    return pl.pallas_call(
        _matmul_bias_kernel,
        out_shape=jax.ShapeDtypeStruct((M, N), out_dtype),
        grid_spec=pltpu.PrefetchScalarGridSpec(
            num_scalar_prefetch=0,
            grid=grid,
            in_specs=[
                pl.BlockSpec((tm, tk), lambda i, j, kb: (i, kb)),
                pl.BlockSpec((tk, tn), lambda i, j, kb: (kb, j)),
                pl.BlockSpec((1, tn), lambda i, j, kb: (0, j)),
            ],
            out_specs=pl.BlockSpec((tm, tn), lambda i, j, kb: (i, j)),
            scratch_shapes=[pltpu.VMEM((tm, tn), jnp.float32)],
        ),
        compiler_params=pltpu.CompilerParams(
            dimension_semantics=("parallel", "parallel", "arbitrary"),
            # Explicit scoped-VMEM budget (default is only 16 MiB on v5e); the chosen
            # bf16 tiles double-buffered need ~6-8 MiB, well under 48 MiB on all gens.
            vmem_limit_bytes=48 * 1024 * 1024),
        cost_estimate=pl.CostEstimate(
            flops=2 * M * N * K,
            transcendentals=0,
            bytes_accessed=(x.dtype.itemsize
                            * (M * K * (N // tn) + K * N * pl.cdiv(M, tm))
                            + jnp.dtype(out_dtype).itemsize * M * N)),
    )(x, w, b2)


# ---------------------------------------------------------------------------
# Flash-style multi-head attention kernel (online softmax over Tk blocks)
# ---------------------------------------------------------------------------

def _make_flash_kernel(kv_len, block_k, need_kv_mask):
    def kernel(q_ref, k_ref, v_ref, o_ref, m_sc, l_sc, acc_sc):
        ki = pl.program_id(3)

        @pl.when(ki == 0)
        def _():
            m_sc[...] = jnp.full(m_sc.shape, -jnp.inf, dtype=m_sc.dtype)
            l_sc[...] = jnp.zeros(l_sc.shape, dtype=l_sc.dtype)
            acc_sc[...] = jnp.zeros(acc_sc.shape, dtype=acc_sc.dtype)

        # Softmax scale is pre-folded into W_q / b_q, so Q is used as-is.  Operands
        # stay in the input dtype (bf16); accumulation in f32 on the MXU.
        q = q_ref[0]                    # (tq, Dh)
        k = k_ref[0]                    # (tk, Dh)
        v = v_ref[0]                    # (tk, Dh)

        # Q K^T contracting the last dims directly (no materialized transpose).
        s = jax.lax.dot_general(
            q, k, dimension_numbers=(((1,), (1,)), ((), ())),
            preferred_element_type=jnp.float32)             # (tq, tk) f32

        if need_kv_mask:                # static: only when a streamed Tk has a tail
            col = ki * block_k + jax.lax.broadcasted_iota(jnp.int32, s.shape, 1)
            s = jnp.where(col < kv_len, s, -1e30)

        m_prev = m_sc[...]
        m_new = jnp.maximum(m_prev, jnp.max(s, axis=-1, keepdims=True))
        alpha = jnp.exp(m_prev - m_new)
        p = jnp.exp(s - m_new)

        l_sc[...] = alpha * l_sc[...] + jnp.sum(p, axis=-1, keepdims=True)
        # TODO(synk): on v6e, pair two heads per grid step so the PV matmul output is
        # 2*Dh wide and fills the 256-wide MXU.
        acc_sc[...] = alpha * acc_sc[...] + jax.lax.dot_general(
            p.astype(v.dtype), v, dimension_numbers=(((1,), (0,)), ((), ())),
            preferred_element_type=jnp.float32)
        m_sc[...] = m_new

        @pl.when(ki == pl.num_programs(3) - 1)
        def _():
            # Exact reciprocal: runs once per (b, h, qi) tile, essentially free, and
            # removes the approx-reciprocal error from the output.
            inv_l = pl.reciprocal(l_sc[...], approx=False)
            o_ref[0] = (acc_sc[...] * inv_l).astype(o_ref.dtype)

    return kernel


def flash_mha(q, k, v, *, num_heads, head_dim,
              q_head0=0, k_head0=0, v_head0=0,
              block_q=512, block_k=1024,
              kv_resident_bytes=4 * 1024 * 1024):
    """Multi-head attention on [B, T, n*Dh]-layout arrays (no transposes).

    Head h of Q lives at column-block (q_head0 + h) of width `head_dim` in `q`,
    and similarly for K/V.  Returns [B, Tq, num_heads * head_dim]."""
    B, Tq = q.shape[0], q.shape[1]
    Tk = k.shape[1]
    Dh = head_dim
    assert k.shape[0] == B and v.shape[0] == B and v.shape[1] == Tk

    # Head slices must be lane-aligned (multiple of 128) or the whole last dim.
    lane_ok = (Dh % 128 == 0) or (
        q.shape[-1] == Dh and k.shape[-1] == Dh and v.shape[-1] == Dh
        and q_head0 == 0 and k_head0 == 0 and v_head0 == 0)
    assert lane_ok, "head_dim must be a multiple of 128 (or num_heads == 1)"
    # TODO(synk): support sub-128 head dims (pack multiple heads per lane block).

    # Q blocks: big (512) when possible; cdiv grid handles non-divisible Tq (tail
    # query rows read garbage, produce garbage rows that are dropped on write).
    tq = block_q if Tq >= block_q else Tq
    grid_q = pl.cdiv(Tq, tq)

    # Collapse the ki grid axis whenever the whole K+V for one (b, h) fits a modest
    # VMEM budget: K/V are then read from HBM once per (b, h) (Pallas skips the
    # re-fetch across consecutive qi steps since the block index is unchanged) and
    # all per-ki pipeline overhead disappears.  Otherwise stream in block_k tiles.
    kv_bytes = 2 * Tk * Dh * k.dtype.itemsize
    if kv_bytes <= kv_resident_bytes:
        tk = Tk
    else:
        tk = block_k if Tk >= block_k else Tk
    grid_k = pl.cdiv(Tk, tk)
    need_kv_mask = (Tk % tk) != 0       # masked tail when K/V is streamed in tiles

    # Parallel axes (B, H, qi) feed both TensorCores on v7x; reduction (ki) is last.
    grid = (B, num_heads, grid_q, grid_k)

    flops = 4 * B * num_heads * Tq * Tk * Dh                 # QK^T + PV
    transcendentals = B * num_heads * Tq * Tk                # exp
    kv_passes = 1 if grid_k == 1 else grid_q
    bytes_accessed = q.dtype.itemsize * B * num_heads * (
        Tq * Dh + 2 * Tk * Dh * kv_passes + Tq * Dh)

    return pl.pallas_call(
        _make_flash_kernel(Tk, tk, need_kv_mask),
        out_shape=jax.ShapeDtypeStruct((B, Tq, num_heads * Dh), q.dtype),
        grid_spec=pltpu.PrefetchScalarGridSpec(
            num_scalar_prefetch=0,
            grid=grid,
            in_specs=[
                pl.BlockSpec((1, tq, Dh), lambda b, h, qi, ki: (b, qi, q_head0 + h)),
                # TODO(synk): if profiling shows exposed K/V DMA in the streamed path,
                # add pipeline_mode=pl.Buffered(3) on these two specs.
                pl.BlockSpec((1, tk, Dh), lambda b, h, qi, ki: (b, ki, k_head0 + h)),
                pl.BlockSpec((1, tk, Dh), lambda b, h, qi, ki: (b, ki, v_head0 + h)),
            ],
            out_specs=pl.BlockSpec((1, tq, Dh), lambda b, h, qi, ki: (b, qi, h)),
            scratch_shapes=[
                pltpu.VMEM((tq, 1), jnp.float32),    # running max  m
                pltpu.VMEM((tq, 1), jnp.float32),    # running sum  l
                pltpu.VMEM((tq, Dh), jnp.float32),   # output accumulator
            ],
        ),
        compiler_params=pltpu.CompilerParams(
            dimension_semantics=("parallel", "parallel", "parallel", "arbitrary"),
            vmem_limit_bytes=48 * 1024 * 1024),
        cost_estimate=pl.CostEstimate(
            flops=flops, transcendentals=transcendentals,
            bytes_accessed=bytes_accessed),
    )(q, k, v)


# ---------------------------------------------------------------------------
# Parameters: raw init + one-time kernel-ready preparation
# ---------------------------------------------------------------------------

def init_params(key, embed_dim):
    """Deterministic synthetic init mirroring nn.Linear shapes (4 linears), f32."""
    bound = 1.0 / math.sqrt(embed_dim)
    names = ["q", "k", "v", "out"]
    keys = jax.random.split(key, 2 * len(names))
    params = {}
    for i, n in enumerate(names):
        w = jax.random.uniform(keys[2 * i], (embed_dim, embed_dim),
                               jnp.float32, -bound, bound)
        b = jax.random.uniform(keys[2 * i + 1], (embed_dim,),
                               jnp.float32, -bound, bound)
        params[n] = (w, b)
    return params


def prepare_params(params, num_heads, *, compute_dtype=jnp.bfloat16):
    """One-time prep: fold the softmax scale into W_q/b_q, pre-fuse the QKV weight for
    the self-attention path, and cast matmul operands to bf16 (biases stay f32)."""
    wq, bq = params["q"]
    wk, bk = params["k"]
    wv, bv = params["v"]
    wo, bo = params["out"]
    D = wq.shape[0]
    Dh = D // num_heads
    scale = 1.0 / math.sqrt(Dh)
    wq_s, bq_s = wq * scale, bq * scale           # scale folded -> free in the kernel
    return {
        "w_qkv": jnp.concatenate([wq_s, wk, wv], axis=1).astype(compute_dtype),
        "b_qkv": jnp.concatenate([bq_s, bk, bv], axis=0).astype(jnp.float32),
        "wq": wq_s.astype(compute_dtype), "bq": bq_s.astype(jnp.float32),
        "wk": wk.astype(compute_dtype),   "bk": bk.astype(jnp.float32),
        "wv": wv.astype(compute_dtype),   "bv": bv.astype(jnp.float32),
        "wo": wo.astype(compute_dtype),   "bo": bo.astype(jnp.float32),
    }


# ---------------------------------------------------------------------------
# Module wrapper (glue in plain JAX, hot path in Pallas)
# ---------------------------------------------------------------------------

def memory_optimized_attention(prepared, query, key, value, num_heads,
                               *, compute_dtype=jnp.bfloat16):
    """Inference-mode forward of MemoryOptimizedAttention (mask=None).

    Dropout is identity in eval mode; gradient checkpointing does not change
    forward values."""
    B, Tq, D = query.shape
    Tk = key.shape[1]
    assert D % num_heads == 0
    Dh = D // num_heads

    xq = query.reshape(B * Tq, D).astype(compute_dtype)

    if (query is key) and (key is value):
        # Self-attention: one fused [D, 3D] projection (weight pre-fused at prep time)
        # -> the activation is read from HBM once.  Q/K/V head tiles are picked
        # straight out of the fused activation by column-offset BlockSpecs.
        qkv = linear(xq, prepared["w_qkv"], prepared["b_qkv"],
                     out_dtype=compute_dtype).reshape(B, Tq, 3 * D)
        attn = flash_mha(qkv, qkv, qkv, num_heads=num_heads, head_dim=Dh,
                         q_head0=0, k_head0=num_heads, v_head0=2 * num_heads)
    else:
        xk = key.reshape(B * Tk, D).astype(compute_dtype)
        xv = value.reshape(B * Tk, D).astype(compute_dtype)
        Q = linear(xq, prepared["wq"], prepared["bq"],
                   out_dtype=compute_dtype).reshape(B, Tq, D)
        K = linear(xk, prepared["wk"], prepared["bk"],
                   out_dtype=compute_dtype).reshape(B, Tk, D)
        V = linear(xv, prepared["wv"], prepared["bv"],
                   out_dtype=compute_dtype).reshape(B, Tk, D)
        attn = flash_mha(Q, K, V, num_heads=num_heads, head_dim=Dh)

    # Attention output is already [B, Tq, H*Dh] row-major -> free reshape.
    out = linear(attn.reshape(B * Tq, D), prepared["wo"], prepared["bo"],
                 out_dtype=query.dtype).reshape(B, Tq, D)
    return out


# ---------------------------------------------------------------------------
# Main
# ---------------------------------------------------------------------------

if __name__ == "__main__":
    # Small but TPU-aligned shapes: head_dim = 128 (lane-aligned), seq multiple of 128.
    B, T, D, H = 2, 256, 256, 2
    TK_CROSS = 384

    root = jax.random.PRNGKey(0)
    kparam, kx, kk, kv = jax.random.split(root, 4)

    raw_params = init_params(kparam, D)
    params = prepare_params(raw_params, H)   # bf16, scale folded, QKV fused once

    # Pure-JAX f32 reference (same math as the PyTorch module's eval-mode forward).
    def ref_forward(params, q, k, v, num_heads):
        Bn, Tqn, Dn = q.shape
        Dh = Dn // num_heads
        wq, bq = params["q"]; wk, bk = params["k"]
        wv, bv = params["v"]; wo, bo = params["out"]
        Q = (q @ wq + bq).reshape(Bn, Tqn, num_heads, Dh).transpose(0, 2, 1, 3)
        K = (k @ wk + bk).reshape(Bn, -1, num_heads, Dh).transpose(0, 2, 1, 3)
        V = (v @ wv + bv).reshape(Bn, -1, num_heads, Dh).transpose(0, 2, 1, 3)
        s = jnp.einsum("bhqd,bhkd->bhqk", Q, K) / math.sqrt(Dh)
        a = jax.nn.softmax(s, axis=-1)
        o = jnp.einsum("bhqk,bhkd->bhqd", a, V)
        o = o.transpose(0, 2, 1, 3).reshape(Bn, Tqn, Dn)
        return o @ wo + bo

    # Tolerance covers bf16 MXU operands (kernel) vs the f32 XLA reference.
    ATOL = RTOL = 3e-2

    # 1) Self-attention (fused [D,3D] QKV projection path, resident-K/V flash).
    x = jax.random.normal(kx, (B, T, D), jnp.float32)
    out_self = jax.block_until_ready(memory_optimized_attention(params, x, x, x, H))
    ref_self = ref_forward(raw_params, x, x, x, H)
    assert out_self.shape == (B, T, D)
    assert jnp.allclose(out_self, ref_self, atol=ATOL, rtol=RTOL), "self-attn mismatch"

    # 2) Cross-attention (separate projections, Tq != Tk).
    k_in = jax.random.normal(kk, (B, TK_CROSS, D), jnp.float32)
    v_in = jax.random.normal(kv, (B, TK_CROSS, D), jnp.float32)
    out_x = jax.block_until_ready(memory_optimized_attention(params, x, k_in, v_in, H))
    ref_x = ref_forward(raw_params, x, k_in, v_in, H)
    assert out_x.shape == (B, T, D)
    assert jnp.allclose(out_x, ref_x, atol=ATOL, rtol=RTOL), "cross-attn mismatch"

    print("KERNEL_OK")
</pallas_src>

<mosaic_0001>
module attributes {stable_mosaic.version = 11 : i64} {
  func.func @_matmul_bias_kernel(%arg0: i32, %arg1: i32, %arg2: i32, %arg3: memref<512x256xbf16, #tpu.memory_space<vmem>>, %arg4: memref<256x256xbf16, #tpu.memory_space<vmem>>, %arg5: memref<1x256xf32, #tpu.memory_space<vmem>>, %arg6: memref<512x256xbf16, #tpu.memory_space<vmem>>, %arg7: memref<512x256xf32, #tpu.memory_space<vmem>>) attributes {dimension_semantics = [#tpu.dimension_semantics<parallel>, #tpu.dimension_semantics<parallel>, #tpu.dimension_semantics<arbitrary>], iteration_bounds = array<i64: 1, 3, 1>, scalar_prefetch = 0 : i64, scratch_operands = 1 : i64, tpu.core_type = #tpu.core_type<tc>, window_params = [{transform_indices = @transform_0, window_bounds = array<i64: 512, 256>}, {transform_indices = @transform_1, window_bounds = array<i64: 256, 256>}, {transform_indices = @transform_2, window_bounds = array<i64: 1, 256>}, {transform_indices = @transform_3, window_bounds = array<i64: 512, 256>}]} {
    %c0_i32 = arith.constant 0 : i32
    %0 = arith.cmpi eq, %arg2, %c0_i32 : i32
    %1 = arith.extui %0 : i1 to i32
    %c0_i32_0 = arith.constant 0 : i32
    %2 = arith.cmpi ne, %1, %c0_i32_0 : i32
    scf.if %2 {
      %cst_10 = arith.constant 0.000000e+00 : f32
      %12 = vector.broadcast %cst_10 : f32 to vector<512x256xf32>
      %c0_11 = arith.constant 0 : index
      %c0_12 = arith.constant 0 : index
      %13 = vector.load %arg7[%c0_11, %c0_12] : memref<512x256xf32, #tpu.memory_space<vmem>>, vector<512x256xf32>
      tpu.vector_store %arg7[%c0_11, %c0_12], %12 {strides = array<i32>} : memref<512x256xf32, #tpu.memory_space<vmem>>, vector<512x256xf32>,
    } else {
    }
    %c0 = arith.constant 0 : index
    %c0_1 = arith.constant 0 : index
    %3 = vector.load %arg7[%c0, %c0_1] : memref<512x256xf32, #tpu.memory_space<vmem>>, vector<512x256xf32>
    %c0_2 = arith.constant 0 : index
    %c0_3 = arith.constant 0 : index
    %4 = vector.load %arg3[%c0_2, %c0_3] : memref<512x256xbf16, #tpu.memory_space<vmem>>, vector<512x256xbf16>
    %c0_4 = arith.constant 0 : index
    %c0_5 = arith.constant 0 : index
    %5 = vector.load %arg4[%c0_4, %c0_5] : memref<256x256xbf16, #tpu.memory_space<vmem>>, vector<256x256xbf16>
    %cst = arith.constant dense<0.000000e+00> : vector<512x256xf32>
    %6 = tpu.matmul %4, %5, %cst {dimension_numbers = #tpu.dot_dimension_numbers<[1], [0], [0], [1], [0, 0, 1, 1], [], []>} : vector<512x256xbf16>, vector<256x256xbf16>, vector<512x256xf32> -> vector<512x256xf32>
    %7 = arith.addf %3, %6 : vector<512x256xf32>
    %c0_6 = arith.constant 0 : index
    %c0_7 = arith.constant 0 : index
    %8 = vector.load %arg7[%c0_6, %c0_7] : memref<512x256xf32, #tpu.memory_space<vmem>>, vector<512x256xf32>
    tpu.vector_store %arg7[%c0_6, %c0_7], %7 {strides = array<i32>} : memref<512x256xf32, #tpu.memory_space<vmem>>, vector<512x256xf32>,
    %c0_i32_8 = arith.constant 0 : i32
    %9 = arith.cmpi eq, %arg2, %c0_i32_8 : i32
    %10 = arith.extui %9 : i1 to i32
    %c0_i32_9 = arith.constant 0 : i32
    %11 = arith.cmpi ne, %10, %c0_i32_9 : i32
    scf.if %11 {
      %c0_10 = arith.constant 0 : index
      %c0_11 = arith.constant 0 : index
      %12 = vector.load %arg7[%c0_10, %c0_11] : memref<512x256xf32, #tpu.memory_space<vmem>>, vector<512x256xf32>
      %c0_12 = arith.constant 0 : index
      %c0_13 = arith.constant 0 : index
      %13 = vector.load %arg5[%c0_12, %c0_13] : memref<1x256xf32, #tpu.memory_space<vmem>>, vector<1x256xf32>
      %14 = vector.broadcast %13 : vector<1x256xf32> to vector<512x256xf32>
      %15 = arith.addf %12, %14 : vector<512x256xf32>
      %16 = arith.truncf %15 : vector<512x256xf32> to vector<512x256xbf16>
      %c0_14 = arith.constant 0 : index
      %c0_15 = arith.constant 0 : index
      %17 = vector.load %arg6[%c0_14, %c0_15] : memref<512x256xbf16, #tpu.memory_space<vmem>>, vector<512x256xbf16>
      tpu.vector_store %arg6[%c0_14, %c0_15], %16 {strides = array<i32>} : memref<512x256xbf16, #tpu.memory_space<vmem>>, vector<512x256xbf16>,
    } else {
    }
    return
  }
  func.func @transform_0(%arg0: i32, %arg1: i32, %arg2: i32) -> (i32, i32) {
    %c0_i32 = arith.constant 0 : i32
    return %arg0, %arg2 : i32, i32
  }
  func.func @transform_1(%arg0: i32, %arg1: i32, %arg2: i32) -> (i32, i32) {
    %c0_i32 = arith.constant 0 : i32
    return %arg2, %arg1 : i32, i32
  }
  func.func @transform_2(%arg0: i32, %arg1: i32, %arg2: i32) -> (i32, i32) {
    %c0_i32 = arith.constant 0 : i32
    %c0_i32_0 = arith.constant 0 : i32
    return %c0_i32, %arg1 : i32, i32
  }
  func.func @transform_3(%arg0: i32, %arg1: i32, %arg2: i32) -> (i32, i32) {
    %c0_i32 = arith.constant 0 : i32
    return %arg0, %arg1 : i32, i32
  }
}

</mosaic_0001>

<bundles_post_ra>
// kernel: tpu_custom_call.1
= control target key start
LH: loop header
LB: loop body
LE: loop exit
PB: predicated region body
PF: predicated region fallthrough
CT: control target
= control target key end

     0   :  { %s3746_s0 = inlined_call_operand.hbm [shape: bf16[512,256], index: 0, kind: input, shape index: {}]   ;;  %s3747_s1 = inlined_call_operand.hbm [shape: bf16[256,768], index: 1, kind: input, shape index: {}]   ;;  %s3748_s2 = inlined_call_operand.hbm [shape: f32[1,768], index: 2, kind: input, shape index: {}]   ;;  %s3749_s3 = inlined_call_operand.hbm [shape: bf16[512,768], index: 3, kind: output, shape index: {}]  }
   0x1   :  { %3755 = sst [smem:[#allocation13_spill]] %s3747_s1 }
   0x2   :  { %8 = vsyncpa [#allocation4], 0 }
   0x3   :  { %9 = vsyncpa [#allocation7], 0 }
   0x4   :  { %11 = vsyncpa [#allocation7 + $0x1], 0 }
   0x5   :  { %12 = vsyncpa [#allocation5], 0 }
   0x6   :  { %14 = vsyncpa [#allocation5 + $0x1], 0  ;;  %s3299_s12 = smov 0   ;;  %s3301_s13 = smov 0  }
   0x7   :  { %s3303_s14 = smov 0   ;;  %s3305_s15 = smov 0  }
   0x8   :  { %s3307_s16 = smov 0   ;;  %s3309_s17 = smov 0  }
   0x9 LB: > { %s35_s18 = sadd.s32 1, %s3263_s16  ;;  %s76_s19 = sadd.s32 1, %s3255_s14  ;;  %s3267_s17 = sphi %s3309_s17, %s20_s17   ;;  %s3263_s16 = sphi %s3307_s16, %s3775_s16   ;;  %s3259_s15 = sphi %s3305_s15, %s3774_s15   ;;  %s3255_s14 = sphi %s3303_s14, %s3773_s14   ;;  %s3251_s13 = sphi %s3301_s13, %s3772_s13   ;;  %s3247_s12 = sphi %s3299_s12, %s3771_s12  }
   0xa   : > { %p37_p0 = scmp.ge.s32.totalorder %s35_s18, 3  ;;  %p83_p1 = scmp.ne.s32.totalorder %s3255_s14, %s3251_s13 }
   0xb   : > { %p84_p2 = scmp.eq.s32.totalorder %s3267_s17, 0  ;;  %p2899_p5 = scmp.lt.s32.totalorder %s3267_s17, 3 }
   0xc   : > { %s3777_s18 = smov (%p37_p0, %s35_s18), 0  ;;  %s186_s22 = sand.u32 1, %s3267_s17  }
   0xd   : > { %p3339_p3 = por %p84_p2, %p83_p1  ;;  %s72_s21 = ssub.s32 %s3263_s16, %s3777_s18 }
   0xe   : > { %p74_p4 = scmp.eq.s32.totalorder %s72_s21, 0  ;;  %s188_s23 = sand.u32 1, %s3255_s14  }
   0xf   : > { %s2598_s25 = sshll.u32 %s188_s23, 8  ;;  %s2774_s26 = sshll.u32 %s3263_s16, 7 }
  0x10   : > { %s3349_s24 = scalar_select %p74_p4, %s3255_s14, %s76_s19  }
  0x11   : > { %s3757_s1 = sld [smem:[#allocation13_spill]]  ;;  %s190_s30 = scalar_lea.vmem [#allocation6], %s2598_s25 }
  0x12   : > { %s200_s4 = sshll.u32 %s190_s30, 4  ;;  %p3359_p6 = pnand %p2899_p5, %p3339_p3  ;;  %s201_s4 = int_to_ptr.vmem [resolvable:$true] %s200_s4 }
  0x13   : > { %s3363_s6 = scalar_lea.sflag [#allocation7], %s186_s22  ;;  %s3114_s7 = scalar_lea.vmem %s201_s4, 4096 }
  0x14   : > { %p3103_p7 = pneg %p3359_p6  ;;  %p3115_p8 = scmp.ne.s32.totalorder %s201_s4, %s3114_s7 }
  0x15   : > { %s3269_s8 = smov [#allocation6]  }
  0x16   : > { %p3117_p9 = pnand %p3115_p8, %p3103_p7  ;;  %s3119_s9 = sshll.u32 %s3269_s8, 4  ;;  %s3120_s9 = int_to_ptr.vmem [resolvable:$false] %s3119_s9 }
  0x17   : > { %s199_s29 = scalar_lea.hbm %s3757_s1, %s2774_s26  ;;  %s3121_s10 = scalar_lea.vmem %s3120_s9, 8192 }
  0x18   : > { %p3118_p10 = pneg %p3117_p9  ;;  %p3122_p11 = scmp.lt.s32.totalorder %s201_s4, %s3120_s9 }
  0x19   : > { %p3123_p12 = scmp.lt.s32.totalorder %s3121_s10, %s3114_s7 }
  0x1b   : > { %p3124_p13 = por %p3123_p12, %p3122_p11 }
  0x1d   : > { %p3125_p0 = pnand %p3124_p13, %p3118_p10 }
  0x1f   : > { %3128 = shalt.err (!%p3125_p0)
}
  0x20   : > { %s3270_s11 = smov 384   ;;  %s3750_s19 = smov 128  }
  0x21   : > { %s3751_s20 = smov 8   ;;  %s3376_s21 = sadd.s32 4294967295, %s3267_s17  }
  0x22   : > { %2890 = dma.hbm_to_vmem [thread:$0]  (!%p3359_p6), %s199_s29, 4096, %s201_s4, %s3363_s6, %s3270_s11, %s3750_s19, %s3751_s20  }
  0x23   : > { %s2594_s22 = sadd.s32 4294967294, %s3267_s17   ;;  %p89_p2 = scmp.ne.s32.totalorder %s3251_s13, %s3247_s12 }
  0x24   : > { %p3753_p3 = scmp.eq.s32.totalorder %s3376_s21, 0  ;;  %p141_p4 = scmp.eq.s32.totalorder %s3376_s21, 2 }
  0x25   : > { %p147_p5 = scmp.eq.s32.totalorder %s2594_s22, 2  ;;  %p2595_p9 = scmp.ge.s32.totalorder %s3267_s17, 1 }
  0x26   : > { %p3385_p8 = por %p3753_p3, %p89_p2  ;;  %p3393_p10 = por %p141_p4, %p83_p1 }
  0x27   : > { %p3397_p11 = por %p147_p5, %p89_p2  ;;  %p154_p12 = scmp.lt.s32.totalorder %s3267_s17, 4 }
  0x28   : > { %s3759_s25 = scalar_select %p3385_p8, 1, 0 }
  0x29   : > { %s3760_s26 = scalar_select %p3393_p10, 1, 0 }
  0x2a   : > { %s3761_s27 = scalar_select %p3397_p11, 1, 0 }
  0x2b   : > { %s2601_s28 = sshll.u32 %s188_s23, 1  ;;  %p3404_p13 = pnand %p2595_p9, %p154_p12 }
  0x2c   : > { %s3273_s30 = smov [#allocation3]   ;;  %s2775_s7 = sshll.u32 %s3263_s16, 5 }
  0x2d   : > { %s172_s4 = sshll.u32 %s3273_s30, 4  ;;  %p2883_p1 = pneg %p3404_p13  ;;  %s3408_s4 = int_to_ptr.vmem [resolvable:$true] %s172_s4 }
  0x2e   : > { %s220_s10 = scalar_lea.hbm %s3748_s2, %s2775_s7  ;;  %s214_s11 = scalar_lea.vmem [#allocation8], %s2601_s28 }
  0x2f   : > { %s222_s22 = sshll.u32 %s214_s11, 4  ;;  %p3418_p0 = pnand %p2883_p1, %p3753_p3  ;;  %s223_s22 = int_to_ptr.vmem [resolvable:$true] %s222_s22 }
  0x30   : > { %s3142_s19 = scalar_lea.vmem %s223_s22, 32  ;;  %s3274_s30 = smov [#allocation8]  }
  0x31   : > { %p3143_p2 = scmp.ne.s32.totalorder %s223_s22, %s3142_s19  ;;  %s3147_s20 = sshll.u32 %s3274_s30, 4  ;;  %s3148_s20 = int_to_ptr.vmem [resolvable:$false] %s3147_s20 }
  0x32   : > { %s3149_s1 = scalar_lea.vmem %s3148_s20, 64  ;;  %p3150_p9 = scmp.lt.s32.totalorder %s223_s22, %s3148_s20 }
  0x33   : > { %p3145_p4 = pnand %p3143_p2, %p3103_p7  ;;  %p3151_p12 = scmp.lt.s32.totalorder %s3149_s1, %s3142_s19 }
  0x35   : > { %p3146_p5 = pneg %p3145_p4  ;;  %p3152_p11 = por %p3151_p12, %p3150_p9 }
  0x37   : > { %p3153_p10 = pnand %p3152_p11, %p3146_p5 }
  0x39   : > { %3156 = shalt.err (!%p3153_p10)
}
  0x3a   : > { %2893 = dma.hbm_to_vmem [thread:$0]  (!%p3359_p6), %s220_s10, 32, %s223_s22, %s3363_s6  }
  0x3b   : > { %p3159_p7 = pneg %p3418_p0  ;;  %s3168_s28 = scalar_lea.vmem %s3408_s4, 8192 }
  0x3c   : > { %p3169_p1 = scmp.ne.s32.totalorder %s3408_s4, %s3168_s28  ;;  %p3176_p3 = scmp.lt.s32.totalorder %s3408_s4, %s3408_s4 }
  0x3d   : > { %p3177_p8 = scmp.lt.s32.totalorder %s3168_s28, %s3168_s28 }
  0x3e   : > { %p3171_p2 = pnand %p3169_p1, %p3159_p7 }
  0x3f   : > { %p3178_p9 = por %p3177_p8, %p3176_p3 }
  0x40   : > { %p3172_p4 = pneg %p3171_p2 }
  0x42   : > { %p3179_p11 = pnand %p3178_p9, %p3172_p4 }
  0x44   : > { %3182 = shalt.err (!%p3179_p11)
}
  0x45   : > { %s3764_s1 = smov 8   ;;  %s3765_s5 = smov 128  }
  0x46   : > { %2886 = dma.hbm_to_vmem [thread:$0]  (!%p3418_p0), %s3746_s0, 8192, %s3408_s4, [#allocation4], %s3765_s5, %s3765_s5, %s3764_s1  }
  0x47   : > { %231 = sbr.rel (%p3404_p13) target bundleno = 485 (0x1e5), region = 32  ;;  %p3766_p6 = scmp.eq.s32.totalorder (!%p3404_p13), %s3376_s21, 0 }
  0x4c   : > { %3234 = dma.done.wait (%p3766_p6), [#allocation4], 8192   ;;  %p3767_p3 = pmov %p3766_p6 }
  0x4d   : > { %s237_s20 = sand.u32 1, %s3376_s21   ;;  %s3451_s7 = sand.u32 1, %s3251_s13  }
  0x4e   : > { %3236 = vsyncadd (%p3767_p3), [#allocation4], 4294959104  ;;  %s2606_s8 = sshll.u32 %s3451_s7, 8  ;;  %s238_s9 = scalar_lea.sflag [#allocation7], %s237_s20 }
  0x4f   : > { %s3454_s10 = scalar_lea.vmem [#allocation6], %s2606_s8  ;;  %p3768_p8 = scmp.ne.s32.totalorder %s3759_s25, 0 }
  0x51   : > { %3238 = dma.done.wait (%p3768_p8), %s238_s9, 4128  }
  0x52   : > { %3240 = vsyncadd (%p3768_p8), %s238_s9, 4294963168  ;;  %v2957_v0 = vld [vmem:[%s3454_s10 + $0x74] ss:$8 sps:$4 sm:$0xff]   ;;  %v2959_v1 = vld [vmem:[%s3454_s10 + $0x70] ss:$8 sps:$4 sm:$0xff]   ;;  %s2607_s21 = sshll.u32 %s3451_s7, 1 }
  0x53   : > { %1121 = vmatprep.subr.bf16.mxu0 %v2957_v0  ;;  %2841 = vmatprep.subr.bf16.mxu1 %v2957_v0  ;;  %v2960_v2 = vld [vmem:[%s3454_s10 + $0x64] ss:$8 sps:$4 sm:$0xff]   ;;  %v2962_v3 = vld [vmem:[%s3454_s10 + $0x60] ss:$8 sps:$4 sm:$0xff]   ;;  %v2963_v4 = vld [vmem:[%s3454_s10 + $0x54] ss:$8 sps:$4 sm:$0xff]  }
  0x54   : > { %1122 = vmatpush1.bf16.msra.mxu0 %v2959_v1  ;;  %2857 = vmatpush1.bf16.msra.mxu1 %v2959_v1  ;;  %v2965_v5 = vld [vmem:[%s3454_s10 + $0x50] ss:$8 sps:$4 sm:$0xff]   ;;  %v2966_v6 = vld [vmem:[%s3454_s10 + $0x44] ss:$8 sps:$4 sm:$0xff]   ;;  %v2968_v7 = vld [vmem:[%s3454_s10 + $0x40] ss:$8 sps:$4 sm:$0xff]  }
  0x55   : > { %1123 = vmatprep.subr.bf16.mxu0 %v2960_v2  ;;  %2842 = vmatprep.subr.bf16.mxu1 %v2960_v2  ;;  %v2969_v8 = vld [vmem:[%s3454_s10 + $0x34] ss:$8 sps:$4 sm:$0xff]   ;;  %v2971_v9 = vld [vmem:[%s3454_s10 + $0x30] ss:$8 sps:$4 sm:$0xff]   ;;  %v2972_v10 = vld [vmem:[%s3454_s10 + $0x24] ss:$8 sps:$4 sm:$0xff]  }
  0x56   : > { %v2974_v11 = vld [vmem:[%s3454_s10 + $0x20] ss:$8 sps:$4 sm:$0xff]   ;;  %v2975_v12 = vld [vmem:[%s3454_s10 + $0x14] ss:$8 sps:$4 sm:$0xff]   ;;  %v3007_v13 = vld [vmem:[#allocation3 + $0x4] ss:$8 sps:$4 sm:$0xff]  }
  0x57   : > { %v2977_v14 = vld [vmem:[%s3454_s10 + $0x10] ss:$8 sps:$4 sm:$0xff]   ;;  %v3010_v15 = vld [vmem:[#allocation3 + $0x104] ss:$8 sps:$4 sm:$0xff]   ;;  %1153 = vmatprep.mubr.bf16.mxu0 %v3007_v13  ;;  %v2980_v17 = vld [vmem:[%s3454_s10] ss:$8 sps:$4 sm:$0xff]  }
  0x58   : > { %1124 = vmatpush1.bf16.msra.mxu0 %v2962_v3  ;;  %2858 = vmatpush1.bf16.msra.mxu1 %v2962_v3  ;;  %v2978_v16 = vld [vmem:[%s3454_s10 + $0x4] ss:$8 sps:$4 sm:$0xff]   ;;  %v2981_v18 = vld [vmem:[%s3454_s10 + $0xf4] ss:$8 sps:$4 sm:$0xff]   ;;  %v2983_v19 = vld [vmem:[%s3454_s10 + $0xf0] ss:$8 sps:$4 sm:$0xff]  }
  0x59   : > { %1125 = vmatprep.subr.bf16.mxu0 %v2963_v4  ;;  %2843 = vmatprep.subr.bf16.mxu1 %v2963_v4  ;;  %v2984_v20 = vld [vmem:[%s3454_s10 + $0xe4] ss:$8 sps:$4 sm:$0xff]   ;;  %v2986_v21 = vld [vmem:[%s3454_s10 + $0xe0] ss:$8 sps:$4 sm:$0xff]   ;;  %v2987_v22 = vld [vmem:[%s3454_s10 + $0xd4] ss:$8 sps:$4 sm:$0xff]  }
  0x5a   : > { %1313 = vmatprep.mubr.bf16.mxu1 %v3010_v15  ;;  %v2989_v23 = vld [vmem:[%s3454_s10 + $0xd0] ss:$8 sps:$4 sm:$0xff]   ;;  %v2990_v24 = vld [vmem:[%s3454_s10 + $0xc4] ss:$8 sps:$4 sm:$0xff]   ;;  %v2992_v25 = vld [vmem:[%s3454_s10 + $0xc0] ss:$8 sps:$4 sm:$0xff]  }
  0x5b   : > { %v2993_v26 = vld [vmem:[%s3454_s10 + $0xb4] ss:$8 sps:$4 sm:$0xff]   ;;  %v2995_v27 = vld [vmem:[%s3454_s10 + $0xb0] ss:$8 sps:$4 sm:$0xff]   ;;  %v2996_v28 = vld [vmem:[%s3454_s10 + $0xa4] ss:$8 sps:$4 sm:$0xff]  }
  0x5c   : > { %1126 = vmatpush1.bf16.msra.mxu0 %v2965_v5  ;;  %2859 = vmatpush1.bf16.msra.mxu1 %v2965_v5  ;;  %v2998_v29 = vld [vmem:[%s3454_s10 + $0xa0] ss:$8 sps:$4 sm:$0xff]   ;;  %v2999_v30 = vld [vmem:[%s3454_s10 + $0x94] ss:$8 sps:$4 sm:$0xff]   ;;  %v3001_v31 = vld [vmem:[%s3454_s10 + $0x90] ss:$8 sps:$4 sm:$0xff]  }
  0x5d   : > { %1127 = vmatprep.subr.bf16.mxu0 %v2966_v6  ;;  %2844 = vmatprep.subr.bf16.mxu1 %v2966_v6  ;;  %v3002_v32 = vld [vmem:[%s3454_s10 + $0x84] ss:$8 sps:$4 sm:$0xff]   ;;  %v3004_v33 = vld [vmem:[%s3454_s10 + $0x80] ss:$8 sps:$4 sm:$0xff]   ;;  %v3011_v36 = vld [vmem:[#allocation3 + $0x14] ss:$8 sps:$4 sm:$0xff]  }
  0x5e   : > { %v3005_v34 = vld [vmem:[#allocation3] ss:$8 sps:$4 sm:$0xff]   ;;  %v3013_v37 = vld [vmem:[#allocation3 + $0x114] ss:$8 sps:$4 sm:$0xff]   ;;  %v3015_v38 = vld [vmem:[#allocation3 + $0x10] ss:$8 sps:$4 sm:$0xff]  }
  0x5f   : > { %v3008_v35 = vld [vmem:[#allocation3 + $0x100] ss:$8 sps:$4 sm:$0xff]   ;;  %v3016_v39 = vld [vmem:[#allocation3 + $0x110] ss:$8 sps:$4 sm:$0xff]   ;;  %v3017_v40 = vld [vmem:[#allocation3 + $0x24] ss:$8 sps:$4 sm:$0xff]  }
  0x60   : > { %1128 = vmatpush1.bf16.msra.mxu0 %v2968_v7  ;;  %2860 = vmatpush1.bf16.msra.mxu1 %v2968_v7  ;;  %v3019_v41 = vld [vmem:[#allocation3 + $0x124] ss:$8 sps:$4 sm:$0xff]   ;;  %v3021_v42 = vld [vmem:[#allocation3 + $0x20] ss:$8 sps:$4 sm:$0xff]   ;;  %v3023_v44 = vld [vmem:[#allocation3 + $0x34] ss:$8 sps:$4 sm:$0xff]  }
  0x61   : > { %1129 = vmatprep.subr.bf16.mxu0 %v2969_v8  ;;  %2845 = vmatprep.subr.bf16.mxu1 %v2969_v8  ;;  %v3022_v43 = vld [vmem:[#allocation3 + $0x120] ss:$8 sps:$4 sm:$0xff]   ;;  %v3025_v45 = vld [vmem:[#allocation3 + $0x134] ss:$8 sps:$4 sm:$0xff]   ;;  %v3027_v46 = vld [vmem:[#allocation3 + $0x30] ss:$8 sps:$4 sm:$0xff]  }
  0x62   : > { %v3028_v47 = vld [vmem:[#allocation3 + $0x130] ss:$8 sps:$4 sm:$0xff]   ;;  %v3029_v48 = vld [vmem:[#allocation3 + $0x44] ss:$8 sps:$4 sm:$0xff]   ;;  %v3033_v50 = vld [vmem:[#allocation3 + $0x40] ss:$8 sps:$4 sm:$0xff]  }
  0x63   : > { %v3031_v49 = vld [vmem:[#allocation3 + $0x144] ss:$8 sps:$4 sm:$0xff]   ;;  %v3034_v51 = vld [vmem:[#allocation3 + $0x140] ss:$8 sps:$4 sm:$0xff]   ;;  %v3035_v52 = vld [vmem:[#allocation3 + $0x54] ss:$8 sps:$4 sm:$0xff]  }
  0x64   : > { %1130 = vmatpush1.bf16.msra.mxu0 %v2971_v9  ;;  %2861 = vmatpush1.bf16.msra.mxu1 %v2971_v9  ;;  %v3037_v53 = vld [vmem:[#allocation3 + $0x154] ss:$8 sps:$4 sm:$0xff]   ;;  %v3039_v54 = vld [vmem:[#allocation3 + $0x50] ss:$8 sps:$4 sm:$0xff]   ;;  %v3041_v56 = vld [vmem:[#allocation3 + $0x64] ss:$8 sps:$4 sm:$0xff]  }
  0x65   : > { %1131 = vmatprep.subr.bf16.mxu0 %v2972_v10  ;;  %2846 = vmatprep.subr.bf16.mxu1 %v2972_v10  ;;  %v3040_v55 = vld [vmem:[#allocation3 + $0x150] ss:$8 sps:$4 sm:$0xff]   ;;  %v3043_v57 = vld [vmem:[#allocation3 + $0x164] ss:$8 sps:$4 sm:$0xff]   ;;  %v3045_v58 = vld [vmem:[#allocation3 + $0x60] ss:$8 sps:$4 sm:$0xff]  }
  0x66   : > { %v3046_v59 = vld [vmem:[#allocation3 + $0x160] ss:$8 sps:$4 sm:$0xff]   ;;  %v3047_v60 = vld [vmem:[#allocation3 + $0x74] ss:$8 sps:$4 sm:$0xff]   ;;  %v3051_v62 = vld [vmem:[#allocation3 + $0x70] ss:$8 sps:$4 sm:$0xff]  }
  0x67   : > { %v3049_v61 = vld [vmem:[#allocation3 + $0x174] ss:$8 sps:$4 sm:$0xff]   ;;  %v3052_v63 = vld [vmem:[#allocation3 + $0x170] ss:$8 sps:$4 sm:$0xff]   ;;  %v3053_v0 = vld [vmem:[#allocation3 + $0x84] ss:$8 sps:$4 sm:$0xff]  }
  0x68   : > { %1132 = vmatpush1.bf16.msra.mxu0 %v2974_v11  ;;  %2862 = vmatpush1.bf16.msra.mxu1 %v2974_v11  ;;  %v3055_v1 = vld [vmem:[#allocation3 + $0x184] ss:$8 sps:$4 sm:$0xff]   ;;  %v3057_v2 = vld [vmem:[#allocation3 + $0x80] ss:$8 sps:$4 sm:$0xff]   ;;  %v3059_v4 = vld [vmem:[#allocation3 + $0x94] ss:$8 sps:$4 sm:$0xff]  }
  0x69   : > { %1133 = vmatprep.subr.bf16.mxu0 %v2975_v12  ;;  %2847 = vmatprep.subr.bf16.mxu1 %v2975_v12  ;;  %v3058_v3 = vld [vmem:[#allocation3 + $0x180] ss:$8 sps:$4 sm:$0xff]   ;;  %v3061_v5 = vld [vmem:[#allocation3 + $0x194] ss:$8 sps:$4 sm:$0xff]   ;;  %v3063_v6 = vld [vmem:[#allocation3 + $0x90] ss:$8 sps:$4 sm:$0xff]  }
  0x6a   : > { %v3064_v7 = vld [vmem:[#allocation3 + $0x190] ss:$8 sps:$4 sm:$0xff]   ;;  %v3065_v8 = vld [vmem:[#allocation3 + $0xa4] ss:$8 sps:$4 sm:$0xff]   ;;  %v3069_v10 = vld [vmem:[#allocation3 + $0xa0] ss:$8 sps:$4 sm:$0xff]  }
  0x6b   : > { %v3067_v9 = vld [vmem:[#allocation3 + $0x1a4] ss:$8 sps:$4 sm:$0xff]   ;;  %v3070_v11 = vld [vmem:[#allocation3 + $0x1a0] ss:$8 sps:$4 sm:$0xff]   ;;  %v3071_v12 = vld [vmem:[#allocation3 + $0xb4] ss:$8 sps:$4 sm:$0xff]  }
  0x6c   : > { %1134 = vmatpush1.bf16.msra.mxu0 %v2977_v14  ;;  %2863 = vmatpush1.bf16.msra.mxu1 %v2977_v14  ;;  %v3073_v13 = vld [vmem:[#allocation3 + $0x1b4] ss:$8 sps:$4 sm:$0xff]   ;;  %v3075_v14 = vld [vmem:[#allocation3 + $0xb0] ss:$8 sps:$4 sm:$0xff]   ;;  %s250_s25 = scalar_lea.vmem [#allocation8], %s2607_s21  ;;  %s2608_s29 = sshll.u32 %s3451_s7, 9 }
  0x6d   : > { %1135 = vmatprep.subr.bf16.mxu0 %v2978_v16  ;;  %2848 = vmatprep.subr.bf16.mxu1 %v2978_v16  ;;  %v3076_v15 = vld [vmem:[#allocation3 + $0x1b0] ss:$8 sps:$4 sm:$0xff]   ;;  %v3077_v16 = vld [vmem:[#allocation3 + $0xc4] ss:$8 sps:$4 sm:$0xff]   ;;  %s3502_s4 = scalar_lea.vmem [#allocation9], %s2608_s29  ;;  %s2840_s11 = sshll.u32 %s3259_s15, 7 }
  0x6e   : > { %s2466_s22 = sshll.u32 %s3502_s4, 4  ;;  %s3695_s30 = scalar_lea.hbm %s3749_s3, %s2840_s11  ;;  %s3697_s22 = int_to_ptr.vmem [resolvable:$true] %s2466_s22 }
  0x6f   : > { %s2450_s28 = scalar_lea.sflag [#allocation5], %s3451_s7  ;;  %s3183_s1 = scalar_lea.vmem %s3697_s22, 8192 }
  0x70   : > { %1136 = vmatpush1.bf16.msra.mxu0 %v2980_v17  ;;  %2864 = vmatpush1.bf16.msra.mxu1 %v2980_v17  ;;  %v3079_v17 = vld [vmem:[#allocation3 + $0x1c4] ss:$8 sps:$4 sm:$0xff]   ;;  %p3184_p10 = scmp.ne.s32.totalorder %s3697_s22, %s3183_s1  ;;  %p3769_p13 = scmp.ne.s32.totalorder %s3760_s26, 0 }
  0x71   : > { %1137 = vmatprep.subr.bf16.mxu0 %v2981_v18  ;;  %2849 = vmatprep.subr.bf16.mxu1 %v2981_v18  ;;  %v3081_v18 = vld [vmem:[#allocation3 + $0xc0] ss:$8 sps:$4 sm:$0xff]   ;;  %s3275_s5 = smov [#allocation9]  }
  0x72   : > { %p3185_p0 = pnand %p3184_p10, %p3769_p13  ;;  %s3187_s19 = sshll.u32 %s3275_s5, 4  ;;  %s3188_s19 = int_to_ptr.vmem [resolvable:$false] %s3187_s19 }
  0x73   : > { %s3189_s6 = scalar_lea.vmem %s3188_s19, 16384  ;;  %p3190_p12 = scmp.lt.s32.totalorder %s3697_s22, %s3188_s19 }
  0x74   : > { %1138 = vmatpush2.bf16.msra.mxu0 %v2983_v19  ;;  %2865 = vmatpush2.bf16.msra.mxu1 %v2983_v19  ;;  %v3082_v19 = vld [vmem:[#allocation3 + $0x1c0] ss:$8 sps:$4 sm:$0xff]   ;;  %p3186_p5 = pneg %p3185_p0  ;;  %p3191_p7 = scmp.lt.s32.totalorder %s3189_s6, %s3183_s1 }
  0x75   : > { %1139 = vmatprep.subr.bf16.mxu0 %v2984_v20  ;;  %2850 = vmatprep.subr.bf16.mxu1 %v2984_v20  ;;  %v3083_v20 = vld [vmem:[#allocation3 + $0xd4] ss:$8 sps:$4 sm:$0xff]  }
  0x76   : > { %p3192_p1 = por %p3191_p7, %p3190_p12 }
  0x78   : > { %1140 = vmatpush2.bf16.msra.mxu0 %v2986_v21  ;;  %2866 = vmatpush2.bf16.msra.mxu1 %v2986_v21  ;;  %v3085_v21 = vld [vmem:[#allocation3 + $0x1d4] ss:$8 sps:$4 sm:$0xff]   ;;  %p3193_p2 = pnand %p3192_p1, %p3186_p5 }
  0x79   : > { %1141 = vmatprep.subr.bf16.mxu0 %v2987_v22  ;;  %2851 = vmatprep.subr.bf16.mxu1 %v2987_v22  ;;  %v3087_v22 = vld [vmem:[#allocation3 + $0xd0] ss:$8 sps:$4 sm:$0xff]  }
  0x7c   : > { %1142 = vmatpush2.bf16.msra.mxu0 %v2989_v23  ;;  %2867 = vmatpush2.bf16.msra.mxu1 %v2989_v23  ;;  %v3088_v23 = vld [vmem:[#allocation3 + $0x1d0] ss:$8 sps:$4 sm:$0xff]  }
  0x7d   : > { %1143 = vmatprep.subr.bf16.mxu0 %v2990_v24  ;;  %2852 = vmatprep.subr.bf16.mxu1 %v2990_v24  ;;  %v3089_v24 = vld [vmem:[#allocation3 + $0xe4] ss:$8 sps:$4 sm:$0xff]  }
  0x80   : > { %1144 = vmatpush2.bf16.msra.mxu0 %v2992_v25  ;;  %2868 = vmatpush2.bf16.msra.mxu1 %v2992_v25  ;;  %v3091_v25 = vld [vmem:[#allocation3 + $0x1e4] ss:$8 sps:$4 sm:$0xff]  }
  0x81   : > { %1145 = vmatprep.subr.bf16.mxu0 %v2993_v26  ;;  %2853 = vmatprep.subr.bf16.mxu1 %v2993_v26  ;;  %v3093_v26 = vld [vmem:[#allocation3 + $0xe0] ss:$8 sps:$4 sm:$0xff]  }
  0x84   : > { %1146 = vmatpush2.bf16.msra.mxu0 %v2995_v27  ;;  %2869 = vmatpush2.bf16.msra.mxu1 %v2995_v27  ;;  %v3094_v27 = vld [vmem:[#allocation3 + $0x1e0] ss:$8 sps:$4 sm:$0xff]  }
  0x85   : > { %1147 = vmatprep.subr.bf16.mxu0 %v2996_v28  ;;  %2854 = vmatprep.subr.bf16.mxu1 %v2996_v28  ;;  %v3095_v28 = vld [vmem:[#allocation3 + $0xf4] ss:$8 sps:$4 sm:$0xff]  }
  0x88   : > { %1148 = vmatpush2.bf16.msra.mxu0 %v2998_v29  ;;  %2870 = vmatpush2.bf16.msra.mxu1 %v2998_v29  ;;  %v3097_v29 = vld [vmem:[#allocation3 + $0x1f4] ss:$8 sps:$4 sm:$0xff]  }
  0x89   : > { %1149 = vmatprep.subr.bf16.mxu0 %v2999_v30  ;;  %2855 = vmatprep.subr.bf16.mxu1 %v2999_v30  ;;  %v3099_v30 = vld [vmem:[#allocation3 + $0xf0] ss:$8 sps:$4 sm:$0xff]  }
  0x8c   : > { %1150 = vmatpush2.bf16.msra.mxu0 %v3001_v31  ;;  %2871 = vmatpush2.bf16.msra.mxu1 %v3001_v31  ;;  %v3100_v31 = vld [vmem:[#allocation3 + $0x1f0] ss:$8 sps:$4 sm:$0xff]  }
  0x8d   : > { %1151 = vmatprep.subr.bf16.mxu0 %v3002_v32  ;;  %2856 = vmatprep.subr.bf16.mxu1 %v3002_v32  ;;  %v1863_v32 = vlaneseq }
  0x90   : > { %1152 = vmatpush2.bf16.msra.mxu0 %v3004_v33  ;;  %2872 = vmatpush2.bf16.msra.mxu1 %v3004_v33  ;;  %v1864_v33 = vshrl.u32 %v1863_v32, 7 }
  0x93   : > { %1154 = vmatmul.mubr.bf16.vlgmr.msra.gmra.mxu0 %v3005_v34  ;;  %1314 = vmatmul.mubr.bf16.vlgmr.msra.gmra.mxu1 %v3008_v35  ;;  %v1865_v34 = vsub.s32 0, %v1864_v33  ;;  %v1869_v35 = vsub.s32 1, %v1864_v33 }
  0x94   : > { %1163 = vmatprep.mubr.bf16.mxu0 %v3011_v36  ;;  %1323 = vmatprep.mubr.bf16.mxu1 %v3013_v37  ;;  %v1861_v36 = vld [vmem:[%s250_s25] sm:$0x3] }
  0x95   : > { %v3493_v37 = vrot.slane %v1861_v36, %v1865_v34 }
  0x9b   : > { %1164 = vmatmul.mubr.bf16.gmra.mxu0 %v3015_v38  ;;  %1324 = vmatmul.mubr.bf16.gmra.mxu1 %v3016_v39  ;;  %v3495_v38 = vrot.slane %v1861_v36, %v1869_v35 }
  0x9c   : > { %1173 = vmatprep.mubr.bf16.mxu0 %v3017_v40  ;;  %1333 = vmatprep.mubr.bf16.mxu1 %v3019_v41 }
  0xa3   : > { %1174 = vmatmul.mubr.bf16.gmra.mxu0 %v3021_v42  ;;  %1334 = vmatmul.mubr.bf16.gmra.mxu1 %v3022_v43 }
  0xa4   : > { %1183 = vmatprep.mubr.bf16.mxu0 %v3023_v44  ;;  %1343 = vmatprep.mubr.bf16.mxu1 %v3025_v45 }
  0xab   : > { %1184 = vmatmul.mubr.bf16.gmra.mxu0 %v3027_v46  ;;  %1344 = vmatmul.mubr.bf16.gmra.mxu1 %v3028_v47 }
  0xac   : > { %1193 = vmatprep.mubr.bf16.mxu0 %v3029_v48  ;;  %1353 = vmatprep.mubr.bf16.mxu1 %v3031_v49 }
  0xb3   : > { %1194 = vmatmul.mubr.bf16.gmra.mxu0 %v3033_v50  ;;  %1354 = vmatmul.mubr.bf16.gmra.mxu1 %v3034_v51 }
  0xb4   : > { %1203 = vmatprep.mubr.bf16.mxu0 %v3035_v52  ;;  %1363 = vmatprep.mubr.bf16.mxu1 %v3037_v53 }
  0xbb   : > { %1204 = vmatmul.mubr.bf16.gmra.mxu0 %v3039_v54  ;;  %1364 = vmatmul.mubr.bf16.gmra.mxu1 %v3040_v55 }
  0xbc   : > { %1213 = vmatprep.mubr.bf16.mxu0 %v3041_v56  ;;  %1373 = vmatprep.mubr.bf16.mxu1 %v3043_v57 }
  0xc3   : > { %1214 = vmatmul.mubr.bf16.gmra.mxu0 %v3045_v58  ;;  %1374 = vmatmul.mubr.bf16.gmra.mxu1 %v3046_v59 }
  0xc4   : > { %1223 = vmatprep.mubr.bf16.mxu0 %v3047_v60  ;;  %1383 = vmatprep.mubr.bf16.mxu1 %v3049_v61 }
  0xcb   : > { %1224 = vmatmul.mubr.bf16.gmra.mxu0 %v3051_v62  ;;  %1384 = vmatmul.mubr.bf16.gmra.mxu1 %v3052_v63 }
  0xcc   : > { %1233 = vmatprep.mubr.bf16.mxu0 %v3053_v0  ;;  %1393 = vmatprep.mubr.bf16.mxu1 %v3055_v1 }
  0xd3   : > { %1234 = vmatmul.mubr.bf16.gmra.mxu0 %v3057_v2  ;;  %1394 = vmatmul.mubr.bf16.gmra.mxu1 %v3058_v3 }
  0xd4   : > { %1243 = vmatprep.mubr.bf16.mxu0 %v3059_v4  ;;  %1403 = vmatprep.mubr.bf16.mxu1 %v3061_v5 }
  0xdb   : > { %1244 = vmatmul.mubr.bf16.gmra.mxu0 %v3063_v6  ;;  %1404 = vmatmul.mubr.bf16.gmra.mxu1 %v3064_v7 }
  0xdc   : > { %1253 = vmatprep.mubr.bf16.mxu0 %v3065_v8  ;;  %1413 = vmatprep.mubr.bf16.mxu1 %v3067_v9 }
  0xe3   : > { %1254 = vmatmul.mubr.bf16.gmra.mxu0 %v3069_v10  ;;  %1414 = vmatmul.mubr.bf16.gmra.mxu1 %v3070_v11 }
  0xe4   : > { %1263 = vmatprep.mubr.bf16.mxu0 %v3071_v12  ;;  %1423 = vmatprep.mubr.bf16.mxu1 %v3073_v13 }
  0xeb   : > { %1264 = vmatmul.mubr.bf16.gmra.mxu0 %v3075_v14  ;;  %1424 = vmatmul.mubr.bf16.gmra.mxu1 %v3076_v15 }
  0xec   : > { %1273 = vmatprep.mubr.bf16.mxu0 %v3077_v16  ;;  %1433 = vmatprep.mubr.bf16.mxu1 %v3079_v17 }
  0xf3   : > { %1274 = vmatmul.mubr.bf16.gmra.mxu0 %v3081_v18  ;;  %1434 = vmatmul.mubr.bf16.gmra.mxu1 %v3082_v19 }
  0xf4   : > { %1283 = vmatprep.mubr.bf16.mxu0 %v3083_v20  ;;  %1443 = vmatprep.mubr.bf16.mxu1 %v3085_v21 }
  0xfb   : > { %1284 = vmatmul.mubr.bf16.gmra.mxu0 %v3087_v22  ;;  %1444 = vmatmul.mubr.bf16.gmra.mxu1 %v3088_v23 }
  0xfc   : > { %1293 = vmatprep.mubr.bf16.mxu0 %v3089_v24  ;;  %1453 = vmatprep.mubr.bf16.mxu1 %v3091_v25 }
 0x103   : > { %1294 = vmatmul.mubr.bf16.gmra.mxu0 %v3093_v26  ;;  %1454 = vmatmul.mubr.bf16.gmra.mxu1 %v3094_v27 }
 0x104   : > { %1303 = vmatprep.mubr.bf16.mxu0 %v3095_v28  ;;  %1463 = vmatprep.mubr.bf16.mxu1 %v3097_v29 }
 0x10b   : > { %1304 = vmatmul.mubr.bf16.gmra.mxu0 %v3099_v30  ;;  %1464 = vmatmul.mubr.bf16.gmra.mxu1 %v3100_v31 }
 0x153   : > { %v1155_v39 = vpop.f32.mrf.mxu0  ;;  %v1315_v40 = vpop.f32.mrf.mxu1 }
 0x154   : > { %v1873_v43 = vadd.f32 %v3493_v37, %v1155_v39  ;;  %v1937_v44 = vadd.f32 %v3493_v37, %v1315_v40 }
 0x155   : > { %v1157_v41 = vpop.f32.mrf.mxu0  ;;  %v1317_v42 = vpop.f32.mrf.mxu1 }
 0x156   : > { %v1874_v45 = vadd.f32 %v3495_v38, %v1157_v41  ;;  %v1938_v46 = vadd.f32 %v3495_v38, %v1317_v42 }
 0x157   : > { %v1159_v47 = vpop.f32.mrf.mxu0  ;;  %v1319_v48 = vpop.f32.mrf.mxu1 }
 0x158   : > { %v2776_v49 = vpack.c.bf16 %v1874_v45, %v1873_v43  ;;  %v2808_v50 = vpack.c.bf16 %v1938_v46, %v1937_v44  ;;  %v1875_v53 = vadd.f32 %v3493_v37, %v1159_v47  ;;  %v1939_v54 = vadd.f32 %v3493_v37, %v1319_v48 }
 0x159   : > { %v1161_v51 = vpop.f32.mrf.mxu0  ;;  %v1321_v52 = vpop.f32.mrf.mxu1 }
 0x15a   : > { %2385 = vst [vmem:[%s3502_s4] sm:$0xff] %v2776_v49  ;;  %2417 = vst [vmem:[%s3502_s4 + $0x100] sm:$0xff] %v2808_v50  ;;  %v1876_v55 = vadd.f32 %v3495_v38, %v1161_v51  ;;  %v1940_v56 = vadd.f32 %v3495_v38, %v1321_v52 }
 0x15b   : > { %v1165_v57 = vpop.f32.mrf.mxu0  ;;  %v1325_v58 = vpop.f32.mrf.mxu1 }
 0x15c   : > { %v2777_v59 = vpack.c.bf16 %v1876_v55, %v1875_v53  ;;  %v2809_v60 = vpack.c.bf16 %v1940_v56, %v1939_v54  ;;  %v1877_v63 = vadd.f32 %v3493_v37, %v1165_v57  ;;  %v1941_v0 = vadd.f32 %v3493_v37, %v1325_v58 }
 0x15d   : > { %v1167_v61 = vpop.f32.mrf.mxu0  ;;  %v1327_v62 = vpop.f32.mrf.mxu1 }
 0x15e   : > { %2386 = vst [vmem:[%s3502_s4 + $0x8] sm:$0xff] %v2777_v59  ;;  %2418 = vst [vmem:[%s3502_s4 + $0x108] sm:$0xff] %v2809_v60  ;;  %v1878_v1 = vadd.f32 %v3495_v38, %v1167_v61  ;;  %v1942_v2 = vadd.f32 %v3495_v38, %v1327_v62 }
 0x15f   : > { %v1169_v3 = vpop.f32.mrf.mxu0  ;;  %v1329_v4 = vpop.f32.mrf.mxu1 }
 0x160   : > { %v2778_v5 = vpack.c.bf16 %v1878_v1, %v1877_v63  ;;  %v2810_v6 = vpack.c.bf16 %v1942_v2, %v1941_v0  ;;  %v1879_v9 = vadd.f32 %v3493_v37, %v1169_v3  ;;  %v1943_v10 = vadd.f32 %v3493_v37, %v1329_v4 }
 0x161   : > { %v1171_v7 = vpop.f32.mrf.mxu0  ;;  %v1331_v8 = vpop.f32.mrf.mxu1 }
 0x162   : > { %2387 = vst [vmem:[%s3502_s4 + $0x10] sm:$0xff] %v2778_v5  ;;  %2419 = vst [vmem:[%s3502_s4 + $0x110] sm:$0xff] %v2810_v6  ;;  %v1880_v11 = vadd.f32 %v3495_v38, %v1171_v7  ;;  %v1944_v12 = vadd.f32 %v3495_v38, %v1331_v8 }
 0x163   : > { %v1175_v13 = vpop.f32.mrf.mxu0  ;;  %v1335_v14 = vpop.f32.mrf.mxu1 }
 0x164   : > { %v2779_v15 = vpack.c.bf16 %v1880_v11, %v1879_v9  ;;  %v2811_v16 = vpack.c.bf16 %v1944_v12, %v1943_v10  ;;  %v1881_v19 = vadd.f32 %v3493_v37, %v1175_v13  ;;  %v1945_v20 = vadd.f32 %v3493_v37, %v1335_v14 }
 0x165   : > { %v1177_v17 = vpop.f32.mrf.mxu0  ;;  %v1337_v18 = vpop.f32.mrf.mxu1 }
 0x166   : > { %2388 = vst [vmem:[%s3502_s4 + $0x18] sm:$0xff] %v2779_v15  ;;  %2420 = vst [vmem:[%s3502_s4 + $0x118] sm:$0xff] %v2811_v16  ;;  %v1882_v21 = vadd.f32 %v3495_v38, %v1177_v17  ;;  %v1946_v22 = vadd.f32 %v3495_v38, %v1337_v18 }
 0x167   : > { %v1179_v23 = vpop.f32.mrf.mxu0  ;;  %v1339_v24 = vpop.f32.mrf.mxu1 }
 0x168   : > { %v2780_v25 = vpack.c.bf16 %v1882_v21, %v1881_v19  ;;  %v2812_v26 = vpack.c.bf16 %v1946_v22, %v1945_v20  ;;  %v1883_v29 = vadd.f32 %v3493_v37, %v1179_v23  ;;  %v1947_v30 = vadd.f32 %v3493_v37, %v1339_v24 }
 0x169   : > { %v1181_v27 = vpop.f32.mrf.mxu0  ;;  %v1341_v28 = vpop.f32.mrf.mxu1 }
 0x16a   : > { %2389 = vst [vmem:[%s3502_s4 + $0x20] sm:$0xff] %v2780_v25  ;;  %2421 = vst [vmem:[%s3502_s4 + $0x120] sm:$0xff] %v2812_v26  ;;  %v1884_v31 = vadd.f32 %v3495_v38, %v1181_v27  ;;  %v1948_v32 = vadd.f32 %v3495_v38, %v1341_v28 }
 0x16b   : > { %v1185_v33 = vpop.f32.mrf.mxu0  ;;  %v1345_v34 = vpop.f32.mrf.mxu1 }
 0x16c   : > { %v2781_v35 = vpack.c.bf16 %v1884_v31, %v1883_v29  ;;  %v2813_v36 = vpack.c.bf16 %v1948_v32, %v1947_v30  ;;  %v1885_v41 = vadd.f32 %v3493_v37, %v1185_v33  ;;  %v1949_v42 = vadd.f32 %v3493_v37, %v1345_v34 }
 0x16d   : > { %v1187_v39 = vpop.f32.mrf.mxu0  ;;  %v1347_v40 = vpop.f32.mrf.mxu1 }
 0x16e   : > { %2390 = vst [vmem:[%s3502_s4 + $0x28] sm:$0xff] %v2781_v35  ;;  %2422 = vst [vmem:[%s3502_s4 + $0x128] sm:$0xff] %v2813_v36  ;;  %v1886_v43 = vadd.f32 %v3495_v38, %v1187_v39  ;;  %v1950_v44 = vadd.f32 %v3495_v38, %v1347_v40 }
 0x16f   : > { %v1189_v45 = vpop.f32.mrf.mxu0  ;;  %v1349_v46 = vpop.f32.mrf.mxu1 }
 0x170   : > { %v2782_v47 = vpack.c.bf16 %v1886_v43, %v1885_v41  ;;  %v2814_v48 = vpack.c.bf16 %v1950_v44, %v1949_v42  ;;  %v1887_v51 = vadd.f32 %v3493_v37, %v1189_v45  ;;  %v1951_v52 = vadd.f32 %v3493_v37, %v1349_v46 }
 0x171   : > { %v1191_v49 = vpop.f32.mrf.mxu0  ;;  %v1351_v50 = vpop.f32.mrf.mxu1 }
 0x172   : > { %2391 = vst [vmem:[%s3502_s4 + $0x30] sm:$0xff] %v2782_v47  ;;  %2423 = vst [vmem:[%s3502_s4 + $0x130] sm:$0xff] %v2814_v48  ;;  %v1888_v53 = vadd.f32 %v3495_v38, %v1191_v49  ;;  %v1952_v54 = vadd.f32 %v3495_v38, %v1351_v50 }
 0x173   : > { %v1195_v55 = vpop.f32.mrf.mxu0  ;;  %v1355_v56 = vpop.f32.mrf.mxu1 }
 0x174   : > { %v2783_v57 = vpack.c.bf16 %v1888_v53, %v1887_v51  ;;  %v2815_v58 = vpack.c.bf16 %v1952_v54, %v1951_v52  ;;  %v1889_v61 = vadd.f32 %v3493_v37, %v1195_v55  ;;  %v1953_v62 = vadd.f32 %v3493_v37, %v1355_v56 }
 0x175   : > { %v1197_v59 = vpop.f32.mrf.mxu0  ;;  %v1357_v60 = vpop.f32.mrf.mxu1 }
 0x176   : > { %2392 = vst [vmem:[%s3502_s4 + $0x38] sm:$0xff] %v2783_v57  ;;  %2424 = vst [vmem:[%s3502_s4 + $0x138] sm:$0xff] %v2815_v58  ;;  %v1890_v63 = vadd.f32 %v3495_v38, %v1197_v59  ;;  %v1954_v0 = vadd.f32 %v3495_v38, %v1357_v60 }
 0x177   : > { %v1199_v1 = vpop.f32.mrf.mxu0  ;;  %v1359_v2 = vpop.f32.mrf.mxu1 }
 0x178   : > { %v2784_v3 = vpack.c.bf16 %v1890_v63, %v1889_v61  ;;  %v2816_v4 = vpack.c.bf16 %v1954_v0, %v1953_v62  ;;  %v1891_v7 = vadd.f32 %v3493_v37, %v1199_v1  ;;  %v1955_v8 = vadd.f32 %v3493_v37, %v1359_v2 }
 0x179   : > { %v1201_v5 = vpop.f32.mrf.mxu0  ;;  %v1361_v6 = vpop.f32.mrf.mxu1 }
 0x17a   : > { %2393 = vst [vmem:[%s3502_s4 + $0x40] sm:$0xff] %v2784_v3  ;;  %2425 = vst [vmem:[%s3502_s4 + $0x140] sm:$0xff] %v2816_v4  ;;  %v1892_v9 = vadd.f32 %v3495_v38, %v1201_v5  ;;  %v1956_v10 = vadd.f32 %v3495_v38, %v1361_v6 }
 0x17b   : > { %v1205_v11 = vpop.f32.mrf.mxu0  ;;  %v1365_v12 = vpop.f32.mrf.mxu1 }
 0x17c   : > { %v2785_v13 = vpack.c.bf16 %v1892_v9, %v1891_v7  ;;  %v2817_v14 = vpack.c.bf16 %v1956_v10, %v1955_v8  ;;  %v1893_v17 = vadd.f32 %v3493_v37, %v1205_v11  ;;  %v1957_v18 = vadd.f32 %v3493_v37, %v1365_v12 }
 0x17d   : > { %v1207_v15 = vpop.f32.mrf.mxu0  ;;  %v1367_v16 = vpop.f32.mrf.mxu1 }
 0x17e   : > { %2394 = vst [vmem:[%s3502_s4 + $0x48] sm:$0xff] %v2785_v13  ;;  %2426 = vst [vmem:[%s3502_s4 + $0x148] sm:$0xff] %v2817_v14  ;;  %v1894_v19 = vadd.f32 %v3495_v38, %v1207_v15  ;;  %v1958_v20 = vadd.f32 %v3495_v38, %v1367_v16 }
 0x17f   : > { %v1209_v21 = vpop.f32.mrf.mxu0  ;;  %v1369_v22 = vpop.f32.mrf.mxu1 }
 0x180   : > { %v2786_v23 = vpack.c.bf16 %v1894_v19, %v1893_v17  ;;  %v2818_v24 = vpack.c.bf16 %v1958_v20, %v1957_v18  ;;  %v1895_v27 = vadd.f32 %v3493_v37, %v1209_v21  ;;  %v1959_v28 = vadd.f32 %v3493_v37, %v1369_v22 }
 0x181   : > { %v1211_v25 = vpop.f32.mrf.mxu0  ;;  %v1371_v26 = vpop.f32.mrf.mxu1 }
 0x182   : > { %2395 = vst [vmem:[%s3502_s4 + $0x50] sm:$0xff] %v2786_v23  ;;  %2427 = vst [vmem:[%s3502_s4 + $0x150] sm:$0xff] %v2818_v24  ;;  %v1896_v29 = vadd.f32 %v3495_v38, %v1211_v25  ;;  %v1960_v30 = vadd.f32 %v3495_v38, %v1371_v26 }
 0x183   : > { %v1215_v31 = vpop.f32.mrf.mxu0  ;;  %v1375_v32 = vpop.f32.mrf.mxu1 }
 0x184   : > { %v2787_v33 = vpack.c.bf16 %v1896_v29, %v1895_v27  ;;  %v2819_v34 = vpack.c.bf16 %v1960_v30, %v1959_v28  ;;  %v1897_v39 = vadd.f32 %v3493_v37, %v1215_v31  ;;  %v1961_v40 = vadd.f32 %v3493_v37, %v1375_v32 }
 0x185   : > { %v1217_v35 = vpop.f32.mrf.mxu0  ;;  %v1377_v36 = vpop.f32.mrf.mxu1 }
 0x186   : > { %2396 = vst [vmem:[%s3502_s4 + $0x58] sm:$0xff] %v2787_v33  ;;  %2428 = vst [vmem:[%s3502_s4 + $0x158] sm:$0xff] %v2819_v34  ;;  %v1898_v41 = vadd.f32 %v3495_v38, %v1217_v35  ;;  %v1962_v42 = vadd.f32 %v3495_v38, %v1377_v36 }
 0x187   : > { %v1219_v43 = vpop.f32.mrf.mxu0  ;;  %v1379_v44 = vpop.f32.mrf.mxu1 }
 0x188   : > { %v2788_v45 = vpack.c.bf16 %v1898_v41, %v1897_v39  ;;  %v2820_v46 = vpack.c.bf16 %v1962_v42, %v1961_v40  ;;  %v1899_v49 = vadd.f32 %v3493_v37, %v1219_v43  ;;  %v1963_v50 = vadd.f32 %v3493_v37, %v1379_v44 }
 0x189   : > { %v1221_v47 = vpop.f32.mrf.mxu0  ;;  %v1381_v48 = vpop.f32.mrf.mxu1 }
 0x18a   : > { %2397 = vst [vmem:[%s3502_s4 + $0x60] sm:$0xff] %v2788_v45  ;;  %2429 = vst [vmem:[%s3502_s4 + $0x160] sm:$0xff] %v2820_v46  ;;  %v1900_v51 = vadd.f32 %v3495_v38, %v1221_v47  ;;  %v1964_v52 = vadd.f32 %v3495_v38, %v1381_v48 }
 0x18b   : > { %v1225_v53 = vpop.f32.mrf.mxu0  ;;  %v1385_v54 = vpop.f32.mrf.mxu1 }
 0x18c   : > { %v2789_v55 = vpack.c.bf16 %v1900_v51, %v1899_v49  ;;  %v2821_v56 = vpack.c.bf16 %v1964_v52, %v1963_v50  ;;  %v1901_v59 = vadd.f32 %v3493_v37, %v1225_v53  ;;  %v1965_v60 = vadd.f32 %v3493_v37, %v1385_v54 }
 0x18d   : > { %v1227_v57 = vpop.f32.mrf.mxu0  ;;  %v1387_v58 = vpop.f32.mrf.mxu1 }
 0x18e   : > { %2398 = vst [vmem:[%s3502_s4 + $0x68] sm:$0xff] %v2789_v55  ;;  %2430 = vst [vmem:[%s3502_s4 + $0x168] sm:$0xff] %v2821_v56  ;;  %v1902_v61 = vadd.f32 %v3495_v38, %v1227_v57  ;;  %v1966_v62 = vadd.f32 %v3495_v38, %v1387_v58 }
 0x18f   : > { %v1229_v63 = vpop.f32.mrf.mxu0  ;;  %v1389_v0 = vpop.f32.mrf.mxu1 }
 0x190   : > { %v2790_v1 = vpack.c.bf16 %v1902_v61, %v1901_v59  ;;  %v2822_v2 = vpack.c.bf16 %v1966_v62, %v1965_v60  ;;  %v1903_v5 = vadd.f32 %v3493_v37, %v1229_v63  ;;  %v1967_v6 = vadd.f32 %v3493_v37, %v1389_v0 }
 0x191   : > { %v1231_v3 = vpop.f32.mrf.mxu0  ;;  %v1391_v4 = vpop.f32.mrf.mxu1 }
 0x192   : > { %2399 = vst [vmem:[%s3502_s4 + $0x70] sm:$0xff] %v2790_v1  ;;  %2431 = vst [vmem:[%s3502_s4 + $0x170] sm:$0xff] %v2822_v2  ;;  %v1904_v7 = vadd.f32 %v3495_v38, %v1231_v3  ;;  %v1968_v8 = vadd.f32 %v3495_v38, %v1391_v4 }
 0x193   : > { %v1235_v9 = vpop.f32.mrf.mxu0  ;;  %v1395_v10 = vpop.f32.mrf.mxu1 }
 0x194   : > { %v2791_v11 = vpack.c.bf16 %v1904_v7, %v1903_v5  ;;  %v2823_v12 = vpack.c.bf16 %v1968_v8, %v1967_v6  ;;  %v1905_v15 = vadd.f32 %v3493_v37, %v1235_v9  ;;  %v1969_v16 = vadd.f32 %v3493_v37, %v1395_v10 }
 0x195   : > { %v1237_v13 = vpop.f32.mrf.mxu0  ;;  %v1397_v14 = vpop.f32.mrf.mxu1 }
 0x196   : > { %2400 = vst [vmem:[%s3502_s4 + $0x78] sm:$0xff] %v2791_v11  ;;  %2432 = vst [vmem:[%s3502_s4 + $0x178] sm:$0xff] %v2823_v12  ;;  %v1906_v17 = vadd.f32 %v3495_v38, %v1237_v13  ;;  %v1970_v18 = vadd.f32 %v3495_v38, %v1397_v14 }
 0x197   : > { %v1239_v19 = vpop.f32.mrf.mxu0  ;;  %v1399_v20 = vpop.f32.mrf.mxu1 }
 0x198   : > { %v2792_v21 = vpack.c.bf16 %v1906_v17, %v1905_v15  ;;  %v2824_v22 = vpack.c.bf16 %v1970_v18, %v1969_v16  ;;  %v1907_v25 = vadd.f32 %v3493_v37, %v1239_v19  ;;  %v1971_v26 = vadd.f32 %v3493_v37, %v1399_v20 }
 0x199   : > { %v1241_v23 = vpop.f32.mrf.mxu0  ;;  %v1401_v24 = vpop.f32.mrf.mxu1 }
 0x19a   : > { %2401 = vst [vmem:[%s3502_s4 + $0x80] sm:$0xff] %v2792_v21  ;;  %2433 = vst [vmem:[%s3502_s4 + $0x180] sm:$0xff] %v2824_v22  ;;  %v1908_v27 = vadd.f32 %v3495_v38, %v1241_v23  ;;  %v1972_v28 = vadd.f32 %v3495_v38, %v1401_v24 }
 0x19b   : > { %v1245_v29 = vpop.f32.mrf.mxu0  ;;  %v1405_v30 = vpop.f32.mrf.mxu1 }
 0x19c   : > { %v2793_v31 = vpack.c.bf16 %v1908_v27, %v1907_v25  ;;  %v2825_v32 = vpack.c.bf16 %v1972_v28, %v1971_v26  ;;  %v1909_v35 = vadd.f32 %v3493_v37, %v1245_v29  ;;  %v1973_v36 = vadd.f32 %v3493_v37, %v1405_v30 }
 0x19d   : > { %v1247_v33 = vpop.f32.mrf.mxu0  ;;  %v1407_v34 = vpop.f32.mrf.mxu1 }
 0x19e   : > { %2402 = vst [vmem:[%s3502_s4 + $0x88] sm:$0xff] %v2793_v31  ;;  %2434 = vst [vmem:[%s3502_s4 + $0x188] sm:$0xff] %v2825_v32  ;;  %v1910_v39 = vadd.f32 %v3495_v38, %v1247_v33  ;;  %v1974_v40 = vadd.f32 %v3495_v38, %v1407_v34 }
 0x19f   : > { %v1249_v41 = vpop.f32.mrf.mxu0  ;;  %v1409_v42 = vpop.f32.mrf.mxu1 }
 0x1a0   : > { %v2794_v43 = vpack.c.bf16 %v1910_v39, %v1909_v35  ;;  %v2826_v44 = vpack.c.bf16 %v1974_v40, %v1973_v36  ;;  %v1911_v47 = vadd.f32 %v3493_v37, %v1249_v41  ;;  %v1975_v48 = vadd.f32 %v3493_v37, %v1409_v42 }
 0x1a1   : > { %v1251_v45 = vpop.f32.mrf.mxu0  ;;  %v1411_v46 = vpop.f32.mrf.mxu1 }
 0x1a2   : > { %2403 = vst [vmem:[%s3502_s4 + $0x90] sm:$0xff] %v2794_v43  ;;  %2435 = vst [vmem:[%s3502_s4 + $0x190] sm:$0xff] %v2826_v44  ;;  %v1912_v49 = vadd.f32 %v3495_v38, %v1251_v45  ;;  %v1976_v50 = vadd.f32 %v3495_v38, %v1411_v46 }
 0x1a3   : > { %v1255_v51 = vpop.f32.mrf.mxu0  ;;  %v1415_v52 = vpop.f32.mrf.mxu1 }
 0x1a4   : > { %v2795_v53 = vpack.c.bf16 %v1912_v49, %v1911_v47  ;;  %v2827_v54 = vpack.c.bf16 %v1976_v50, %v1975_v48  ;;  %v1913_v57 = vadd.f32 %v3493_v37, %v1255_v51  ;;  %v1977_v58 = vadd.f32 %v3493_v37, %v1415_v52 }
 0x1a5   : > { %v1257_v55 = vpop.f32.mrf.mxu0  ;;  %v1417_v56 = vpop.f32.mrf.mxu1 }
 0x1a6   : > { %2404 = vst [vmem:[%s3502_s4 + $0x98] sm:$0xff] %v2795_v53  ;;  %2436 = vst [vmem:[%s3502_s4 + $0x198] sm:$0xff] %v2827_v54  ;;  %v1914_v59 = vadd.f32 %v3495_v38, %v1257_v55  ;;  %v1978_v60 = vadd.f32 %v3495_v38, %v1417_v56 }
 0x1a7   : > { %v1259_v61 = vpop.f32.mrf.mxu0  ;;  %v1419_v62 = vpop.f32.mrf.mxu1 }
 0x1a8   : > { %v2796_v63 = vpack.c.bf16 %v1914_v59, %v1913_v57  ;;  %v2828_v0 = vpack.c.bf16 %v1978_v60, %v1977_v58  ;;  %v1915_v3 = vadd.f32 %v3493_v37, %v1259_v61  ;;  %v1979_v4 = vadd.f32 %v3493_v37, %v1419_v62 }
 0x1a9   : > { %v1261_v1 = vpop.f32.mrf.mxu0  ;;  %v1421_v2 = vpop.f32.mrf.mxu1 }
 0x1aa   : > { %2405 = vst [vmem:[%s3502_s4 + $0xa0] sm:$0xff] %v2796_v63  ;;  %2437 = vst [vmem:[%s3502_s4 + $0x1a0] sm:$0xff] %v2828_v0  ;;  %v1916_v5 = vadd.f32 %v3495_v38, %v1261_v1  ;;  %v1980_v6 = vadd.f32 %v3495_v38, %v1421_v2 }
 0x1ab   : > { %v1265_v7 = vpop.f32.mrf.mxu0  ;;  %v1425_v8 = vpop.f32.mrf.mxu1 }
 0x1ac   : > { %v2797_v9 = vpack.c.bf16 %v1916_v5, %v1915_v3  ;;  %v2829_v10 = vpack.c.bf16 %v1980_v6, %v1979_v4  ;;  %v1917_v13 = vadd.f32 %v3493_v37, %v1265_v7  ;;  %v1981_v14 = vadd.f32 %v3493_v37, %v1425_v8 }
 0x1ad   : > { %v1267_v11 = vpop.f32.mrf.mxu0  ;;  %v1427_v12 = vpop.f32.mrf.mxu1 }
 0x1ae   : > { %2406 = vst [vmem:[%s3502_s4 + $0xa8] sm:$0xff] %v2797_v9  ;;  %2438 = vst [vmem:[%s3502_s4 + $0x1a8] sm:$0xff] %v2829_v10  ;;  %v1918_v15 = vadd.f32 %v3495_v38, %v1267_v11  ;;  %v1982_v16 = vadd.f32 %v3495_v38, %v1427_v12 }
 0x1af   : > { %v1269_v17 = vpop.f32.mrf.mxu0  ;;  %v1429_v18 = vpop.f32.mrf.mxu1 }
 0x1b0   : > { %v2798_v19 = vpack.c.bf16 %v1918_v15, %v1917_v13  ;;  %v2830_v20 = vpack.c.bf16 %v1982_v16, %v1981_v14  ;;  %v1919_v23 = vadd.f32 %v3493_v37, %v1269_v17  ;;  %v1983_v24 = vadd.f32 %v3493_v37, %v1429_v18 }
 0x1b1   : > { %v1271_v21 = vpop.f32.mrf.mxu0  ;;  %v1431_v22 = vpop.f32.mrf.mxu1 }
 0x1b2   : > { %2407 = vst [vmem:[%s3502_s4 + $0xb0] sm:$0xff] %v2798_v19  ;;  %2439 = vst [vmem:[%s3502_s4 + $0x1b0] sm:$0xff] %v2830_v20  ;;  %v1920_v25 = vadd.f32 %v3495_v38, %v1271_v21  ;;  %v1984_v26 = vadd.f32 %v3495_v38, %v1431_v22 }
 0x1b3   : > { %v1275_v27 = vpop.f32.mrf.mxu0  ;;  %v1435_v28 = vpop.f32.mrf.mxu1 }
 0x1b4   : > { %v2799_v29 = vpack.c.bf16 %v1920_v25, %v1919_v23  ;;  %v2831_v30 = vpack.c.bf16 %v1984_v26, %v1983_v24  ;;  %v1921_v33 = vadd.f32 %v3493_v37, %v1275_v27  ;;  %v1985_v34 = vadd.f32 %v3493_v37, %v1435_v28 }
 0x1b5   : > { %v1277_v31 = vpop.f32.mrf.mxu0  ;;  %v1437_v32 = vpop.f32.mrf.mxu1 }
 0x1b6   : > { %2408 = vst [vmem:[%s3502_s4 + $0xb8] sm:$0xff] %v2799_v29  ;;  %2440 = vst [vmem:[%s3502_s4 + $0x1b8] sm:$0xff] %v2831_v30  ;;  %v1922_v35 = vadd.f32 %v3495_v38, %v1277_v31  ;;  %v1986_v36 = vadd.f32 %v3495_v38, %v1437_v32 }
 0x1b7   : > { %v1279_v39 = vpop.f32.mrf.mxu0  ;;  %v1439_v40 = vpop.f32.mrf.mxu1 }
 0x1b8   : > { %v2800_v41 = vpack.c.bf16 %v1922_v35, %v1921_v33  ;;  %v2832_v42 = vpack.c.bf16 %v1986_v36, %v1985_v34  ;;  %v1923_v45 = vadd.f32 %v3493_v37, %v1279_v39  ;;  %v1987_v46 = vadd.f32 %v3493_v37, %v1439_v40 }
 0x1b9   : > { %v1281_v43 = vpop.f32.mrf.mxu0  ;;  %v1441_v44 = vpop.f32.mrf.mxu1 }
 0x1ba   : > { %2409 = vst [vmem:[%s3502_s4 + $0xc0] sm:$0xff] %v2800_v41  ;;  %2441 = vst [vmem:[%s3502_s4 + $0x1c0] sm:$0xff] %v2832_v42  ;;  %v1924_v47 = vadd.f32 %v3495_v38, %v1281_v43  ;;  %v1988_v48 = vadd.f32 %v3495_v38, %v1441_v44 }
 0x1bb   : > { %v1285_v49 = vpop.f32.mrf.mxu0  ;;  %v1445_v50 = vpop.f32.mrf.mxu1 }
 0x1bc   : > { %v2801_v51 = vpack.c.bf16 %v1924_v47, %v1923_v45  ;;  %v2833_v52 = vpack.c.bf16 %v1988_v48, %v1987_v46  ;;  %v1925_v55 = vadd.f32 %v3493_v37, %v1285_v49  ;;  %v1989_v56 = vadd.f32 %v3493_v37, %v1445_v50 }
 0x1bd   : > { %v1287_v53 = vpop.f32.mrf.mxu0  ;;  %v1447_v54 = vpop.f32.mrf.mxu1 }
 0x1be   : > { %2410 = vst [vmem:[%s3502_s4 + $0xc8] sm:$0xff] %v2801_v51  ;;  %2442 = vst [vmem:[%s3502_s4 + $0x1c8] sm:$0xff] %v2833_v52  ;;  %v1926_v57 = vadd.f32 %v3495_v38, %v1287_v53  ;;  %v1990_v58 = vadd.f32 %v3495_v38, %v1447_v54 }
 0x1bf   : > { %v1289_v59 = vpop.f32.mrf.mxu0  ;;  %v1449_v60 = vpop.f32.mrf.mxu1 }
 0x1c0   : > { %v2802_v61 = vpack.c.bf16 %v1926_v57, %v1925_v55  ;;  %v2834_v62 = vpack.c.bf16 %v1990_v58, %v1989_v56  ;;  %v1927_v1 = vadd.f32 %v3493_v37, %v1289_v59  ;;  %v1991_v2 = vadd.f32 %v3493_v37, %v1449_v60 }
 0x1c1   : > { %v1291_v63 = vpop.f32.mrf.mxu0  ;;  %v1451_v0 = vpop.f32.mrf.mxu1 }
 0x1c2   : > { %2411 = vst [vmem:[%s3502_s4 + $0xd0] sm:$0xff] %v2802_v61  ;;  %2443 = vst [vmem:[%s3502_s4 + $0x1d0] sm:$0xff] %v2834_v62  ;;  %v1928_v3 = vadd.f32 %v3495_v38, %v1291_v63  ;;  %v1992_v4 = vadd.f32 %v3495_v38, %v1451_v0 }
 0x1c3   : > { %v1295_v5 = vpop.f32.mrf.mxu0  ;;  %v1455_v6 = vpop.f32.mrf.mxu1 }
 0x1c4   : > { %v2803_v7 = vpack.c.bf16 %v1928_v3, %v1927_v1  ;;  %v2835_v8 = vpack.c.bf16 %v1992_v4, %v1991_v2  ;;  %v1929_v11 = vadd.f32 %v3493_v37, %v1295_v5  ;;  %v1993_v12 = vadd.f32 %v3493_v37, %v1455_v6 }
 0x1c5   : > { %v1297_v9 = vpop.f32.mrf.mxu0  ;;  %v1457_v10 = vpop.f32.mrf.mxu1 }
 0x1c6   : > { %2412 = vst [vmem:[%s3502_s4 + $0xd8] sm:$0xff] %v2803_v7  ;;  %2444 = vst [vmem:[%s3502_s4 + $0x1d8] sm:$0xff] %v2835_v8  ;;  %v1930_v13 = vadd.f32 %v3495_v38, %v1297_v9  ;;  %v1994_v14 = vadd.f32 %v3495_v38, %v1457_v10 }
 0x1c7   : > { %v1299_v15 = vpop.f32.mrf.mxu0  ;;  %v1459_v16 = vpop.f32.mrf.mxu1 }
 0x1c8   : > { %v2804_v17 = vpack.c.bf16 %v1930_v13, %v1929_v11  ;;  %v2836_v18 = vpack.c.bf16 %v1994_v14, %v1993_v12  ;;  %v1931_v21 = vadd.f32 %v3493_v37, %v1299_v15  ;;  %v1995_v22 = vadd.f32 %v3493_v37, %v1459_v16 }
 0x1c9   : > { %v1301_v19 = vpop.f32.mrf.mxu0  ;;  %v1461_v20 = vpop.f32.mrf.mxu1 }
 0x1ca   : > { %2413 = vst [vmem:[%s3502_s4 + $0xe0] sm:$0xff] %v2804_v17  ;;  %2445 = vst [vmem:[%s3502_s4 + $0x1e0] sm:$0xff] %v2836_v18  ;;  %v1932_v23 = vadd.f32 %v3495_v38, %v1301_v19  ;;  %v1996_v24 = vadd.f32 %v3495_v38, %v1461_v20 }
 0x1cb   : > { %v1305_v25 = vpop.f32.mrf.mxu0  ;;  %v1465_v26 = vpop.f32.mrf.mxu1 }
 0x1cc   : > { %v2805_v27 = vpack.c.bf16 %v1932_v23, %v1931_v21  ;;  %v2837_v28 = vpack.c.bf16 %v1996_v24, %v1995_v22  ;;  %v1933_v31 = vadd.f32 %v3493_v37, %v1305_v25  ;;  %v1997_v32 = vadd.f32 %v3493_v37, %v1465_v26 }
 0x1cd   : > { %v1307_v29 = vpop.f32.mrf.mxu0  ;;  %v1467_v30 = vpop.f32.mrf.mxu1 }
 0x1ce   : > { %2414 = vst [vmem:[%s3502_s4 + $0xe8] sm:$0xff] %v2805_v27  ;;  %2446 = vst [vmem:[%s3502_s4 + $0x1e8] sm:$0xff] %v2837_v28  ;;  %v1934_v33 = vadd.f32 %v3495_v38, %v1307_v29  ;;  %v1998_v34 = vadd.f32 %v3495_v38, %v1467_v30 }
 0x1cf   : > { %v1309_v35 = vpop.f32.mrf.mxu0  ;;  %v1469_v36 = vpop.f32.mrf.mxu1 }
 0x1d0   : > { %v2806_v39 = vpack.c.bf16 %v1934_v33, %v1933_v31  ;;  %v2838_v40 = vpack.c.bf16 %v1998_v34, %v1997_v32  ;;  %v1935_v43 = vadd.f32 %v3493_v37, %v1309_v35  ;;  %v1999_v44 = vadd.f32 %v3493_v37, %v1469_v36 }
 0x1d1   : > { %v1311_v41 = vpop.f32.mrf.mxu0  ;;  %v1471_v42 = vpop.f32.mrf.mxu1 }
 0x1d2   : > { %2415 = vst [vmem:[%s3502_s4 + $0xf0] sm:$0xff] %v2806_v39  ;;  %2447 = vst [vmem:[%s3502_s4 + $0x1f0] sm:$0xff] %v2838_v40  ;;  %v1936_v45 = vadd.f32 %v3495_v38, %v1311_v41  ;;  %v2000_v46 = vadd.f32 %v3495_v38, %v1471_v42 }
 0x1d4   : > { %v2807_v47 = vpack.c.bf16 %v1936_v45, %v1935_v43  ;;  %v2839_v48 = vpack.c.bf16 %v2000_v46, %v1999_v44 }
 0x1d6   : > { %2416 = vst [vmem:[%s3502_s4 + $0xf8] sm:$0xff] %v2807_v47  ;;  %2448 = vst [vmem:[%s3502_s4 + $0x1f8] sm:$0xff] %v2839_v48 }
 0x1d7   : > { %3196 = shalt.err (!%p3193_p2)
}
 0x1d8   : > { %s3197_s20 = scalar_lea.hbm %s3695_s30, 8192  ;;  %s3201_s10 = scalar_lea.hbm %s3749_s3, 24576 }
 0x1d9   : > { %p3198_p4 = scmp.ne.s32.totalorder %s3695_s30, %s3197_s20  ;;  %p3202_p6 = scmp.lt.s32.totalorder %s3695_s30, %s3749_s3 }
 0x1da   : > { %p3203_p3 = scmp.lt.s32.totalorder %s3201_s10, %s3197_s20 }
 0x1db   : > { %p3199_p9 = pnand %p3198_p4, %p3769_p13 }
 0x1dc   : > { %p3204_p8 = por %p3203_p3, %p3202_p6 }
 0x1dd   : > { %p3200_p11 = pneg %p3199_p9 }
 0x1df   : > { %p3205_p10 = pnand %p3204_p8, %p3200_p11 }
 0x1e1   : > { %3208 = shalt.err (!%p3205_p10)
}
 0x1e2   : > { %s3276_s29 = smov 128   ;;  %s3277_s4 = smov 384  }
 0x1e3   : > { %s3278_s11 = smov 8  }
 0x1e4   : > { %2881 = dma.vmem_to_hbm [thread:$0]  (%p3769_p13), %s3697_s22, 8192, %s3695_s30, %s2450_s28, %s3276_s29, %s3277_s4, %s3278_s11  }
 0x1e5 PF: > { %p2901_p0 = scmp.ge.s32.totalorder %s3267_s17, 2  ;;  %s2481_s15 = sand.u32 1, %s3247_s12  }
 0x1e6   : > { %p3770_p5 = scmp.ne.s32.totalorder %s3761_s27, 0  ;;  %s2482_s23 = scalar_lea.sflag [#allocation5], %s2481_s15 }
 0x1e8   : > { %p2895_p12 = pnand %p2901_p0, %p3770_p5 }
 0x1ea   : > { %p2896_p7 = pneg %p2895_p12 }
 0x1ec   : > { %3242 = dma.done.wait (%p2896_p7), %s2482_s23, 8192  }
 0x1ed   : > { %3244 = vsyncadd (%p2896_p7), %s2482_s23, 4294959104  ;;  %s20_s17 = sadd.s32 1, %s3267_s17   ;;  %s3771_s12 = smov %s3251_s13 }
 0x1ee   : > { %p17_p1 = scmp.ge.s32.totalorder %s20_s17, 5   ;;  %s3772_s13 = smov %s3255_s14 }
 0x1ef   : > { %s3773_s14 = smov %s3349_s24  ;;  %s3774_s15 = smov %s3263_s16 }
 0x1f0   : > { %s3775_s16 = smov %s3777_s18  ;;  %19 = sbr.rel (!%p17_p1) target bundleno = 9 (0x9), region = 102 }
 0x1f5   :  { %2487 = vsyncpa [#allocation4], 1 }
 0x1f6   :  { %2489 = vsyncpa [#allocation4 + $0x1], 1 }
 0x1f7   :  { %2490 = vsyncpa [#allocation7], 1 }
 0x1f8   :  { %2492 = vsyncpa [#allocation7 + $0x1], 1 }
 0x1f9   :  { %2493 = vsyncpa [#allocation5], 1 }
 0x1fa   :  { %2495 = vsyncpa [#allocation5 + $0x1], 1 }

</bundles_post_ra>
